<compile_context>
chip_gen: v5e
topology: v5e:2x2
jax: 0.10.0
libtpu: 0.0.40
codegen_flags: <defaults>
</compile_context>

<pallas_src>
import functools
import math

import jax
import jax.numpy as jnp
from jax.experimental import pallas as pl
from jax.experimental.pallas import tpu as pltpu


def dqn_kernel(x_ref, w1_ref, b1_ref, w2_ref, b2_ref, w3_ref, b3_ref, o_ref):
    # fc1 + ReLU   (bf16 operands -> f32 MXU accumulation; bias/ReLU on VPU)
    h1 = jnp.dot(x_ref[...], w1_ref[...], preferred_element_type=jnp.float32)
    h1 = jnp.maximum(h1 + b1_ref[...], 0.0).astype(jnp.bfloat16)
    # fc2 + ReLU
    h2 = jnp.dot(h1, w2_ref[...], preferred_element_type=jnp.float32)
    h2 = jnp.maximum(h2 + b2_ref[...], 0.0).astype(jnp.bfloat16)
    # fc3 (no activation).  Output columns were padded to a multiple of 128 in
    # the wrapper, so this store is lane-dense (unmasked vst).
    out = jnp.dot(h2, w3_ref[...], preferred_element_type=jnp.float32)
    o_ref[...] = (out + b3_ref[...]).astype(o_ref.dtype)


def _round_up(n, m):
    return ((n + m - 1) // m) * m


def _batch_semantics(num_tiles):
    """CORE_PARALLEL on v7x (2 TCs/chip) so batch tiles shard across cores;
    plain "parallel" elsewhere (no codegen effect, but harmless)."""
    try:
        kind = jax.devices()[0].device_kind.lower()
    except Exception:
        kind = ""
    if "v7" in kind and num_tiles >= 2 and num_tiles % 2 == 0:
        return (pltpu.CORE_PARALLEL,)
    return ("parallel",)


@functools.partial(jax.jit, static_argnames=("tb",))
def dqn_forward(x, w1, b1, w2, b2, w3, b3, *, tb=1024):
    """Fused DQN forward.  x: (B, in_dim) f32.  Returns (B, out_dim) f32."""
    B, in_dim = x.shape
    hidden = w1.shape[1]
    out_dim = w3.shape[1]

    # Balanced batch tiles: split B into ceil(B / tb) near-equal tiles rounded
    # up to a sublane multiple of 8 (tail padding is a few rows, not tb-1).
    num_tiles = max(1, -(-B // tb))
    tb_eff = _round_up(-(-B // num_tiles), 8)
    Bp = num_tiles * tb_eff
    if Bp != B:
        x = jnp.pad(x, ((0, Bp - B), (0, 0)))

    # Lane-dense output: pad the last layer's N up to a multiple of 128.
    n_pad = _round_up(out_dim, 128)
    if n_pad != out_dim:
        w3 = jnp.pad(w3, ((0, 0), (0, n_pad - out_dim)))
        b3 = jnp.pad(b3, ((0, 0), (0, n_pad - out_dim)))

    # bf16 operands for the MXU; biases stay f32 (added to the f32 accumulator).
    x_bf = x.astype(jnp.bfloat16)
    w1_bf = w1.astype(jnp.bfloat16)
    w2_bf = w2.astype(jnp.bfloat16)
    w3_bf = w3.astype(jnp.bfloat16)

    grid = (num_tiles,)

    # Batch-tiled activations; weights/biases resident (constant index_map).
    x_spec = pl.BlockSpec((tb_eff, in_dim), lambda i: (i, 0))
    o_spec = pl.BlockSpec((tb_eff, n_pad), lambda i: (i, 0))
    resident = lambda a: pl.BlockSpec(a.shape, lambda i: (0,) * a.ndim)

    flops = 2 * Bp * (in_dim * hidden + hidden * hidden + hidden * n_pad)
    bytes_accessed = (
        Bp * in_dim * 2                                                # x (bf16)
        + (in_dim * hidden + hidden * hidden + hidden * n_pad) * 2     # weights (bf16)
        + (hidden + hidden + n_pad) * 4                                # biases (f32)
        + Bp * n_pad * 4                                               # output (f32)
    )

    out = pl.pallas_call(
        dqn_kernel,
        out_shape=jax.ShapeDtypeStruct((Bp, n_pad), jnp.float32),
        grid=grid,
        in_specs=[
            x_spec,
            resident(w1_bf), resident(b1),
            resident(w2_bf), resident(b2),
            resident(w3_bf), resident(b3),
        ],
        out_specs=o_spec,
        compiler_params=pltpu.CompilerParams(
            dimension_semantics=_batch_semantics(num_tiles),
        ),
        cost_estimate=pl.CostEstimate(
            flops=flops, transcendentals=0, bytes_accessed=bytes_accessed
        ),
    )(x_bf, w1_bf, b1, w2_bf, b2, w3_bf, b3)

    return out[:B, :out_dim]


def init_linear(key, fan_in, fan_out):
    """Deterministic init mirroring PyTorch nn.Linear default (U[-1/sqrt(fan_in), +]).
    Weight is returned in (in, out) layout for the kernel."""
    kw, kb = jax.random.split(key)
    bound = 1.0 / math.sqrt(fan_in)
    w = jax.random.uniform(kw, (fan_in, fan_out), jnp.float32, -bound, bound)
    b = jax.random.uniform(kb, (1, fan_out), jnp.float32, -bound, bound)
    return w, b


if __name__ == "__main__":
    input_dim = 16
    output_dim = 8
    batch = 2
    hidden = 128

    key = jax.random.PRNGKey(0)
    k_x, k1, k2, k3 = jax.random.split(key, 4)

    x = jax.random.normal(k_x, (batch, input_dim), jnp.float32)
    w1, b1 = init_linear(k1, input_dim, hidden)
    w2, b2 = init_linear(k2, hidden, hidden)
    w3, b3 = init_linear(k3, hidden, output_dim)

    out = dqn_forward(x, w1, b1, w2, b2, w3, b3)
    out = jax.block_until_ready(out)
    assert out.shape == (batch, output_dim)

    # Reference 1: exact bf16-operand / f32-accumulate math (matches kernel).
    xb, w1b, w2b, w3b = (a.astype(jnp.bfloat16) for a in (x, w1, w2, w3))
    r = jnp.maximum(jnp.dot(xb, w1b, preferred_element_type=jnp.float32) + b1, 0.0)
    r = jnp.maximum(
        jnp.dot(r.astype(jnp.bfloat16), w2b, preferred_element_type=jnp.float32) + b2, 0.0
    )
    ref_bf16 = jnp.dot(r.astype(jnp.bfloat16), w3b, preferred_element_type=jnp.float32) + b3
    assert jnp.allclose(out, ref_bf16, atol=1e-3, rtol=1e-3)

    # Reference 2: full f32 math (looser tolerance due to bf16 operands).
    ref = jnp.maximum(x @ w1 + b1, 0.0)
    ref = jnp.maximum(ref @ w2 + b2, 0.0)
    ref = ref @ w3 + b3
    assert jnp.allclose(out, ref, atol=5e-2, rtol=5e-2)

    print("KERNEL_OK")
</pallas_src>

<mosaic_0001>
module attributes {stable_mosaic.version = 11 : i64} {
  func.func @dqn_kernel(%arg0: i32, %arg1: memref<8x16xbf16, #tpu.memory_space<vmem>>, %arg2: memref<16x128xbf16, #tpu.memory_space<vmem>>, %arg3: memref<1x128xf32, #tpu.memory_space<vmem>>, %arg4: memref<128x128xbf16, #tpu.memory_space<vmem>>, %arg5: memref<1x128xf32, #tpu.memory_space<vmem>>, %arg6: memref<128x128xbf16, #tpu.memory_space<vmem>>, %arg7: memref<1x128xf32, #tpu.memory_space<vmem>>, %arg8: memref<8x128xf32, #tpu.memory_space<vmem>>) attributes {dimension_semantics = [#tpu.dimension_semantics<parallel>], iteration_bounds = array<i64: 1>, scalar_prefetch = 0 : i64, scratch_operands = 0 : i64, tpu.core_type = #tpu.core_type<tc>, window_params = [{transform_indices = @transform_0, window_bounds = array<i64: 8, 16>}, {pipeline_mode = #tpu.pipeline_mode<synchronous>, transform_indices = @transform_1, window_bounds = array<i64: 16, 128>}, {pipeline_mode = #tpu.pipeline_mode<synchronous>, transform_indices = @transform_2, window_bounds = array<i64: 1, 128>}, {pipeline_mode = #tpu.pipeline_mode<synchronous>, transform_indices = @transform_3, window_bounds = array<i64: 128, 128>}, {pipeline_mode = #tpu.pipeline_mode<synchronous>, transform_indices = @transform_4, window_bounds = array<i64: 1, 128>}, {pipeline_mode = #tpu.pipeline_mode<synchronous>, transform_indices = @transform_5, window_bounds = array<i64: 128, 128>}, {pipeline_mode = #tpu.pipeline_mode<synchronous>, transform_indices = @transform_6, window_bounds = array<i64: 1, 128>}, {transform_indices = @transform_7, window_bounds = array<i64: 8, 128>}]} {
    %c0 = arith.constant 0 : index
    %c0_0 = arith.constant 0 : index
    %0 = vector.load %arg1[%c0, %c0_0] : memref<8x16xbf16, #tpu.memory_space<vmem>>, vector<8x16xbf16>
    %c0_1 = arith.constant 0 : index
    %c0_2 = arith.constant 0 : index
    %1 = vector.load %arg2[%c0_1, %c0_2] : memref<16x128xbf16, #tpu.memory_space<vmem>>, vector<16x128xbf16>
    %cst = arith.constant dense<0.000000e+00> : vector<8x128xf32>
    %2 = tpu.matmul %0, %1, %cst {dimension_numbers = #tpu.dot_dimension_numbers<[1], [0], [0], [1], [0, 0, 1, 1], [], []>} : vector<8x16xbf16>, vector<16x128xbf16>, vector<8x128xf32> -> vector<8x128xf32>
    %c0_3 = arith.constant 0 : index
    %c0_4 = arith.constant 0 : index
    %3 = vector.load %arg3[%c0_3, %c0_4] : memref<1x128xf32, #tpu.memory_space<vmem>>, vector<1x128xf32>
    %4 = vector.broadcast %3 : vector<1x128xf32> to vector<8x128xf32>
    %5 = arith.addf %2, %4 : vector<8x128xf32>
    %cst_5 = arith.constant 0.000000e+00 : f32
    %6 = vector.broadcast %cst_5 : f32 to vector<8x128xf32>
    %7 = arith.maximumf %5, %6 : vector<8x128xf32>
    %8 = arith.truncf %7 : vector<8x128xf32> to vector<8x128xbf16>
    %c0_6 = arith.constant 0 : index
    %c0_7 = arith.constant 0 : index
    %9 = vector.load %arg4[%c0_6, %c0_7] : memref<128x128xbf16, #tpu.memory_space<vmem>>, vector<128x128xbf16>
    %cst_8 = arith.constant dense<0.000000e+00> : vector<8x128xf32>
    %10 = tpu.matmul %8, %9, %cst_8 {dimension_numbers = #tpu.dot_dimension_numbers<[1], [0], [0], [1], [0, 0, 1, 1], [], []>} : vector<8x128xbf16>, vector<128x128xbf16>, vector<8x128xf32> -> vector<8x128xf32>
    %c0_9 = arith.constant 0 : index
    %c0_10 = arith.constant 0 : index
    %11 = vector.load %arg5[%c0_9, %c0_10] : memref<1x128xf32, #tpu.memory_space<vmem>>, vector<1x128xf32>
    %12 = vector.broadcast %11 : vector<1x128xf32> to vector<8x128xf32>
    %13 = arith.addf %10, %12 : vector<8x128xf32>
    %cst_11 = arith.constant 0.000000e+00 : f32
    %14 = vector.broadcast %cst_11 : f32 to vector<8x128xf32>
    %15 = arith.maximumf %13, %14 : vector<8x128xf32>
    %16 = arith.truncf %15 : vector<8x128xf32> to vector<8x128xbf16>
    %c0_12 = arith.constant 0 : index
    %c0_13 = arith.constant 0 : index
    %17 = vector.load %arg6[%c0_12, %c0_13] : memref<128x128xbf16, #tpu.memory_space<vmem>>, vector<128x128xbf16>
    %cst_14 = arith.constant dense<0.000000e+00> : vector<8x128xf32>
    %18 = tpu.matmul %16, %17, %cst_14 {dimension_numbers = #tpu.dot_dimension_numbers<[1], [0], [0], [1], [0, 0, 1, 1], [], []>} : vector<8x128xbf16>, vector<128x128xbf16>, vector<8x128xf32> -> vector<8x128xf32>
    %c0_15 = arith.constant 0 : index
    %c0_16 = arith.constant 0 : index
    %19 = vector.load %arg7[%c0_15, %c0_16] : memref<1x128xf32, #tpu.memory_space<vmem>>, vector<1x128xf32>
    %20 = vector.broadcast %19 : vector<1x128xf32> to vector<8x128xf32>
    %21 = arith.addf %18, %20 : vector<8x128xf32>
    %c0_17 = arith.constant 0 : index
    %c0_18 = arith.constant 0 : index
    %22 = vector.load %arg8[%c0_17, %c0_18] : memref<8x128xf32, #tpu.memory_space<vmem>>, vector<8x128xf32>
    tpu.vector_store %arg8[%c0_17, %c0_18], %21 {strides = array<i32>} : memref<8x128xf32, #tpu.memory_space<vmem>>, vector<8x128xf32>,
    return
  }
  func.func @transform_0(%arg0: i32) -> (i32, i32) {
    %c0_i32 = arith.constant 0 : i32
    %c0_i32_0 = arith.constant 0 : i32
    return %arg0, %c0_i32 : i32, i32
  }
  func.func @transform_1(%arg0: i32) -> (i32, i32) {
    %c0_i32 = arith.constant 0 : i32
    %c0_i32_0 = arith.constant 0 : i32
    %c0_i32_1 = arith.constant 0 : i32
    return %c0_i32, %c0_i32_0 : i32, i32
  }
  func.func @transform_2(%arg0: i32) -> (i32, i32) {
    %c0_i32 = arith.constant 0 : i32
    %c0_i32_0 = arith.constant 0 : i32
    %c0_i32_1 = arith.constant 0 : i32
    return %c0_i32, %c0_i32_0 : i32, i32
  }
  func.func @transform_3(%arg0: i32) -> (i32, i32) {
    %c0_i32 = arith.constant 0 : i32
    %c0_i32_0 = arith.constant 0 : i32
    %c0_i32_1 = arith.constant 0 : i32
    return %c0_i32, %c0_i32_0 : i32, i32
  }
  func.func @transform_4(%arg0: i32) -> (i32, i32) {
    %c0_i32 = arith.constant 0 : i32
    %c0_i32_0 = arith.constant 0 : i32
    %c0_i32_1 = arith.constant 0 : i32
    return %c0_i32, %c0_i32_0 : i32, i32
  }
  func.func @transform_5(%arg0: i32) -> (i32, i32) {
    %c0_i32 = arith.constant 0 : i32
    %c0_i32_0 = arith.constant 0 : i32
    %c0_i32_1 = arith.constant 0 : i32
    return %c0_i32, %c0_i32_0 : i32, i32
  }
  func.func @transform_6(%arg0: i32) -> (i32, i32) {
    %c0_i32 = arith.constant 0 : i32
    %c0_i32_0 = arith.constant 0 : i32
    %c0_i32_1 = arith.constant 0 : i32
    return %c0_i32, %c0_i32_0 : i32, i32
  }
  func.func @transform_7(%arg0: i32) -> (i32, i32) {
    %c0_i32 = arith.constant 0 : i32
    %c0_i32_0 = arith.constant 0 : i32
    return %arg0, %c0_i32 : i32, i32
  }
}

</mosaic_0001>

<bundles_post_ra>
// kernel: dqn_forward.1
= control target key start
LH: loop header
LB: loop body
LE: loop exit
PB: predicated region body
PF: predicated region fallthrough
CT: control target
= control target key end

     0   :  { %vm40_vm0 = vcmask 130048   ;;  %s423_s1 = inlined_call_operand.vmem [shape: bf16[16,128], index: 1, kind: input, shape index: {}]   ;;  %s424_s0 = inlined_call_operand.vmem [shape: bf16[8,16], index: 0, kind: input, shape index: {}]   ;;  %s425_s3 = inlined_call_operand.vmem [shape: bf16[128,128], index: 3, kind: input, shape index: {}]   ;;  %s426_s2 = inlined_call_operand.vmem [shape: f32[1,128], index: 2, kind: input, shape index: {}]   ;;  %s427_s4 = inlined_call_operand.vmem [shape: f32[1,128], index: 4, kind: input, shape index: {}]   ;;  %s428_s5 = inlined_call_operand.vmem [shape: bf16[128,128], index: 5, kind: input, shape index: {}]   ;;  %s429_s6 = inlined_call_operand.vmem [shape: f32[1,128], index: 6, kind: input, shape index: {}]   ;;  %s430_s7 = inlined_call_operand.vmem [shape: f32[8,128], index: 7, kind: output, shape index: {}]  }
   0x1   :  { %v297_v0 = vld [vmem:[%s423_s1] sm:$0xff]  ;;  %v305_v1 = vld [vmem:[%s425_s3 + $0x38] sm:$0xff]  ;;  %v304_v3 = vld [vmem:[%s425_s3 + $0x30] sm:$0xff] }
   0x2   :  { %51 = vmatpush.bf16.msra.mxu0 %v297_v0  ;;  %v27_v2 = vld [vmem:[%s424_s0] sm:$0xf]  ;;  %127 = vmatpush.bf16.msra.mxu1 %v305_v1  ;;  %v303_v4 = vld [vmem:[%s425_s3 + $0x28] sm:$0xff]  ;;  %v301_v6 = vld [vmem:[%s425_s3 + $0x18] sm:$0xff] }
   0x3   :  { %v302_v5 = vld [vmem:[%s425_s3 + $0x20] sm:$0xff]  ;;  %v300_v7 = vld [vmem:[%s425_s3 + $0x10] sm:$0xff]  ;;  %v299_v8 = vld [vmem:[%s425_s3 + $0x8] sm:$0xff] }
   0x4   :  { %v298_v9 = vld [vmem:[%s425_s3] sm:$0xff]  ;;  %v313_v10 = vld [vmem:[%s428_s5 + $0x38] sm:$0xff]  ;;  %v312_v11 = vld [vmem:[%s428_s5 + $0x30] sm:$0xff] }
   0x5   :  { %232 = vmatmul.msk.bf16.vlgmr.msra.gmra.mxu0 %vm40_vm0, %v27_v2  ;;  %210 = vmatpush.bf16.msra.mxu2 %v313_v10  ;;  %v311_v12 = vld [vmem:[%s428_s5 + $0x28] sm:$0xff]  ;;  %v310_v13 = vld [vmem:[%s428_s5 + $0x20] sm:$0xff]  ;;  %v309_v14 = vld [vmem:[%s428_s5 + $0x18] sm:$0xff] }
   0x6   :  { %128 = vmatpush.bf16.msra.mxu1 %v304_v3  ;;  %v308_v15 = vld [vmem:[%s428_s5 + $0x10] sm:$0xff]  ;;  %v314_v16 = vld [vmem:[%s426_s2] ss:$0 sm:$0xff]  ;;  %v307_v22 = vld [vmem:[%s428_s5 + $0x8] sm:$0xff] }
   0x7   :  { %v306_v23 = vld [vmem:[%s428_s5] sm:$0xff] }
   0x8   :  { %v315_v24 = vld [vmem:[%s427_s4] ss:$0 sm:$0xff] }
   0x9   :  { %211 = vmatpush.bf16.msra.mxu2 %v312_v11  ;;  %v316_v30 = vld [vmem:[%s429_s6] ss:$0 sm:$0xff] }
   0xa   :  { %129 = vmatpush.bf16.msra.mxu1 %v303_v4 }
   0xd   :  { %212 = vmatpush.bf16.msra.mxu2 %v311_v12 }
   0xe   :  { %130 = vmatpush.bf16.msra.mxu1 %v302_v5 }
  0x11   :  { %213 = vmatpush.bf16.msra.mxu2 %v310_v13 }
  0x12   :  { %131 = vmatpush.bf16.msra.mxu1 %v301_v6 }
  0x15   :  { %214 = vmatpush.bf16.msra.mxu2 %v309_v14 }
  0x16   :  { %132 = vmatpush.bf16.msra.mxu1 %v300_v7 }
  0x19   :  { %215 = vmatpush.bf16.msra.mxu2 %v308_v15 }
  0x1a   :  { %133 = vmatpush.bf16.msra.mxu1 %v299_v8 }
  0x1d   :  { %216 = vmatpush.bf16.msra.mxu2 %v307_v22 }
  0x1e   :  { %134 = vmatpush.bf16.msra.mxu1 %v298_v9 }
  0x21   :  { %217 = vmatpush.bf16.msra.mxu2 %v306_v23 }
  0x82   :  { %v53_v17 = vpop.f32.mrf.mxu0 }
  0x83   :  { %v54_v18 = vadd.f32 %v314_v16, %v53_v17 }
  0x85   :  { %v57_v19 = vmax.f32 %v54_v18, 0.0 }
  0x87   :  { %v58_v20 = vpack.c.bf16 %v57_v19, %v57_v19 }
  0x89   :  { %135 = vmatmul.bf16.vlgmr.msra.gmra.mxu1 %v58_v20 }
  0x8a   :  { %v55_v21 = vpop.f32.mrf.mxu0 }
 0x106   :  { %v136_v25 = vpop.f32.mrf.mxu1 }
 0x107   :  { %v137_v26 = vadd.f32 %v315_v24, %v136_v25 }
 0x109   :  { %v140_v27 = vmax.f32 %v137_v26, 0.0 }
 0x10b   :  { %v141_v28 = vpack.c.bf16 %v140_v27, %v140_v27 }
 0x10d   :  { %218 = vmatmul.bf16.vlgmr.msra.gmra.mxu2 %v141_v28 }
 0x10e   :  { %v138_v29 = vpop.f32.mrf.mxu1 }
 0x190   :  { %v219_v31 = vpop.f32.mrf.mxu2 }
 0x191   :  { %v220_v32 = vadd.f32 %v316_v30, %v219_v31 }
 0x193   :  { %223 = vst [vmem:[%s430_s7] sm:$0xff] %v220_v32 }
 0x198   :  { %v221_v33 = vpop.f32.mrf.mxu2 }

</bundles_post_ra>
